<compile_context>
chip_gen: v7x
topology: tpu7x:2x2x1
jax: 0.10.0
libtpu: 0.0.40
codegen_flags: <defaults>
</compile_context>

<pallas_src>
import jax
import jax.numpy as jnp
from jax import lax
from jax.experimental import pallas as pl
from jax.experimental.pallas import tpu as pltpu


def _resblock_kernel(xpad_ref, b1m_ref, b1t_ref, b2m_ref, b2t_ref, bsm_ref,
                     out_ref, h1s_ref):
    # xpad_ref : (H + 2*p1, W*Cin)   H-padded input rows, lane-flattened (w, c)
    # b1m_ref  : (K1, W*Cin, W*C1)   conv1 banded weights (dx + W-pad folded in)
    # b1t_ref  : (1, W*C1)           conv1 bias, tiled over w
    # b2m_ref  : (K2, W*C1, W*C2)    conv2 banded weights
    # b2t_ref  : (1, W*C2)           conv2 bias, tiled over w
    # bsm_ref  : (W*Cin, W*C2)       1x1 shortcut, block-diagonal
    # out_ref  : (H, W*C2)           lane-dense output rows
    # h1s_ref  : (H + 2*p2, W*C1)    VMEM scratch: H-padded conv1 output
    H, _ = out_ref.shape
    K1 = b1m_ref.shape[0]
    K2 = b2m_ref.shape[0]
    WC1 = b1m_ref.shape[2]
    p1 = (K1 - 1) // 2
    p2 = (K2 - 1) // 2

    # ---- conv1: one banded matmul per dy tap (ref-sliced rows) ----
    acc1 = jnp.dot(xpad_ref[0:H, :], b1m_ref[0],
                   preferred_element_type=jnp.float32)
    for dy in range(1, K1):
        acc1 += jnp.dot(xpad_ref[dy:dy + H, :], b1m_ref[dy],
                        preferred_element_type=jnp.float32)
    h1 = jnp.maximum(acc1 + b1t_ref[...], 0.0)          # (H, W*C1) = (16, 128)

    # ---- H-pad conv1 output in scratch (zero only the border rows) ----
    if p2 > 0:
        h1s_ref[0:p2, :] = jnp.zeros((p2, WC1), jnp.float32)
        h1s_ref[p2 + H:2 * p2 + H, :] = jnp.zeros((p2, WC1), jnp.float32)
    h1s_ref[p2:p2 + H, :] = h1

    # ---- conv2: banded matmuls over the scratch rows ----
    acc2 = jnp.dot(h1s_ref[0:H, :], b2m_ref[0],
                   preferred_element_type=jnp.float32)
    for dy in range(1, K2):
        acc2 += jnp.dot(h1s_ref[dy:dy + H, :], b2m_ref[dy],
                        preferred_element_type=jnp.float32)
    acc2 = acc2 + b2t_ref[...]

    # ---- shortcut 1x1 conv: block-diagonal matmul on unpadded interior ----
    sc = jnp.dot(xpad_ref[p1:p1 + H, :], bsm_ref[...],
                 preferred_element_type=jnp.float32)

    # ---- residual add + final ReLU, lane-dense store ----
    out_ref[...] = jnp.maximum(acc2 + sc, 0.0).astype(out_ref.dtype)


def _band_from_hwio(w_hwio, W):
    """(K, K, Cin, Cout) HWIO conv weights -> (K, W*Cin, W*Cout) banded mats.

    B[dy, w'*Cin + c1, w*Cout + c2] = w[dy, w'-w+p, c1, c2] if |w'-w| <= p else 0
    (SAME W-padding and the dx tap loop are folded into the contraction).
    """
    K, _, Cin, Cout = w_hwio.shape
    p = (K - 1) // 2
    wp = jnp.arange(W)[:, None]                 # input column w'
    w = jnp.arange(W)[None, :]                  # output column w
    dx = wp - w + p                             # (W, W)
    valid = (dx >= 0) & (dx < K)
    dxc = jnp.clip(dx, 0, K - 1)
    B = w_hwio[:, dxc, :, :]                    # (K, W, W, Cin, Cout)
    B = jnp.where(valid[None, :, :, None, None], B, 0.0)
    return jnp.transpose(B, (0, 1, 3, 2, 4)).reshape(K, W * Cin, W * Cout)


def _blockdiag_1x1(ws_io, W):
    """(Cin, Cout) 1x1 conv -> (W*Cin, W*Cout) block-diagonal matrix."""
    eye = jnp.eye(W, dtype=ws_io.dtype)
    return jnp.einsum('ij,cd->icjd', eye, ws_io).reshape(
        W * ws_io.shape[0], W * ws_io.shape[1])


@jax.jit
def residual_block_forward(x_nchw, w1_oihw, b1, w2_oihw, b2, ws_oihw):
    """PyTorch-layout ResidualBlock forward.

    x_nchw: (N, Cin, H, W) f32; weights in OIHW; returns (N, C2, H, W) f32.
    """
    N, Cin, H, W = x_nchw.shape
    C1, _, K1, _ = w1_oihw.shape
    C2, _, K2, _ = w2_oihw.shape
    p1 = (K1 - 1) // 2
    p2 = (K2 - 1) // 2

    # ---- weight/bias layout plumbing (done once per call, pure XLA glue) ----
    w1_hwio = jnp.transpose(w1_oihw, (2, 3, 1, 0))
    w2_hwio = jnp.transpose(w2_oihw, (2, 3, 1, 0))
    ws_io = jnp.transpose(ws_oihw[:, :, 0, 0], (1, 0))        # (Cin, C2)

    B1 = _band_from_hwio(w1_hwio, W)                          # (K1, W*Cin, W*C1)
    B2 = _band_from_hwio(w2_hwio, W)                          # (K2, W*C1, W*C2)
    Bs = _blockdiag_1x1(ws_io, W)                             # (W*Cin, W*C2)
    b1t = jnp.tile(b1, W).reshape(1, W * C1)
    b2t = jnp.tile(b2, W).reshape(1, W * C2)

    # ---- activations: NCHW -> lane-dense rows (N, H, W*Cin), pad H only ----
    x_rows = jnp.transpose(x_nchw, (0, 2, 3, 1)).reshape(N, H, W * Cin)
    x_pad = jnp.pad(x_rows, ((0, 0), (p1, p1), (0, 0)))

    out_rows = pl.pallas_call(
        _resblock_kernel,
        out_shape=jax.ShapeDtypeStruct((N, H, W * C2), jnp.float32),
        grid_spec=pltpu.PrefetchScalarGridSpec(
            num_scalar_prefetch=0,
            grid=(N,),
            in_specs=[
                pl.BlockSpec((None, H + 2 * p1, W * Cin), lambda n: (n, 0, 0)),
                pl.BlockSpec((K1, W * Cin, W * C1), lambda n: (0, 0, 0)),
                pl.BlockSpec((1, W * C1), lambda n: (0, 0)),
                pl.BlockSpec((K2, W * C1, W * C2), lambda n: (0, 0, 0)),
                pl.BlockSpec((1, W * C2), lambda n: (0, 0)),
                pl.BlockSpec((W * Cin, W * C2), lambda n: (0, 0)),
            ],
            out_specs=pl.BlockSpec((None, H, W * C2), lambda n: (n, 0, 0)),
            scratch_shapes=[pltpu.VMEM((H + 2 * p2, W * C1), jnp.float32)],
        ),
        compiler_params=pltpu.CompilerParams(
            dimension_semantics=("parallel",)),
    )(x_pad, B1, b1t, B2, b2t, Bs)

    # lane-dense rows -> NHWC -> NCHW (PyTorch convention)
    return jnp.transpose(out_rows.reshape(N, H, W, C2), (0, 3, 1, 2))


def _ref_forward(x_nchw, w1_oihw, b1, w2_oihw, b2, ws_oihw):
    """Pure-JAX reference mirroring the PyTorch module (NCHW / OIHW)."""
    dn = ('NCHW', 'OIHW', 'NCHW')
    y = lax.conv_general_dilated(x_nchw, w1_oihw, (1, 1), 'SAME',
                                 dimension_numbers=dn) + b1[None, :, None, None]
    y = jnp.maximum(y, 0.0)
    y = lax.conv_general_dilated(y, w2_oihw, (1, 1), 'SAME',
                                 dimension_numbers=dn) + b2[None, :, None, None]
    s = lax.conv_general_dilated(x_nchw, ws_oihw, (1, 1), 'SAME',
                                 dimension_numbers=dn)
    return jnp.maximum(y + s, 0.0)


if __name__ == "__main__":
    # module config: in_channels=4, channels=[8, 8], kernel_sizes=[3, 3]
    N, Cin, H, W = 2, 4, 16, 16
    C1, C2, K1, K2 = 8, 8, 3, 3

    key = jax.random.PRNGKey(0)
    kx, kw1, kb1, kw2, kb2, kws = jax.random.split(key, 6)

    x = jax.random.normal(kx, (N, Cin, H, W), jnp.float32)          # NCHW
    w1 = 0.1 * jax.random.normal(kw1, (C1, Cin, K1, K1), jnp.float32)
    b1 = 0.1 * jax.random.normal(kb1, (C1,), jnp.float32)
    w2 = 0.1 * jax.random.normal(kw2, (C2, C1, K2, K2), jnp.float32)
    b2 = 0.1 * jax.random.normal(kb2, (C2,), jnp.float32)
    ws = 0.1 * jax.random.normal(kws, (C2, Cin, 1, 1), jnp.float32)  # shortcut

    out = residual_block_forward(x, w1, b1, w2, b2, ws)
    out = jax.block_until_ready(out)

    ref = _ref_forward(x, w1, b1, w2, b2, ws)
    assert out.shape == (N, C2, H, W)
    assert jnp.allclose(out, ref, atol=1e-3, rtol=1e-3), "mismatch vs reference"

    print("KERNEL_OK")
</pallas_src>

<mosaic_0001>
module attributes {stable_mosaic.version = 11 : i64} {
  func.func @_resblock_kernel(%arg0: i32, %arg1: memref<1x18x64xf32, #tpu.memory_space<vmem>>, %arg2: memref<3x64x128xf32, #tpu.memory_space<vmem>>, %arg3: memref<1x128xf32, #tpu.memory_space<vmem>>, %arg4: memref<3x128x128xf32, #tpu.memory_space<vmem>>, %arg5: memref<1x128xf32, #tpu.memory_space<vmem>>, %arg6: memref<64x128xf32, #tpu.memory_space<vmem>>, %arg7: memref<1x16x128xf32, #tpu.memory_space<vmem>>, %arg8: memref<18x128xf32, #tpu.memory_space<vmem>>) attributes {dimension_semantics = [#tpu.dimension_semantics<parallel>], iteration_bounds = array<i64: 2>, scalar_prefetch = 0 : i64, scratch_operands = 1 : i64, tpu.core_type = #tpu.core_type<tc>, window_params = [{transform_indices = @transform_0, window_bounds = array<i64: 1, 18, 64>}, {pipeline_mode = #tpu.pipeline_mode<synchronous>, transform_indices = @transform_1, window_bounds = array<i64: 3, 64, 128>}, {pipeline_mode = #tpu.pipeline_mode<synchronous>, transform_indices = @transform_2, window_bounds = array<i64: 1, 128>}, {pipeline_mode = #tpu.pipeline_mode<synchronous>, transform_indices = @transform_3, window_bounds = array<i64: 3, 128, 128>}, {pipeline_mode = #tpu.pipeline_mode<synchronous>, transform_indices = @transform_4, window_bounds = array<i64: 1, 128>}, {pipeline_mode = #tpu.pipeline_mode<synchronous>, transform_indices = @transform_5, window_bounds = array<i64: 64, 128>}, {transform_indices = @transform_6, window_bounds = array<i64: 1, 16, 128>}]} {
    %c0 = arith.constant 0 : index
    %c0_0 = arith.constant 0 : index
    %c0_1 = arith.constant 0 : index
    %0 = vector.load %arg1[%c0, %c0_0, %c0_1] : memref<1x18x64xf32, #tpu.memory_space<vmem>>, vector<1x16x64xf32>
    %1 = vector.shape_cast %0 : vector<1x16x64xf32> to vector<16x64xf32>
    %c0_2 = arith.constant 0 : index
    %c0_3 = arith.constant 0 : index
    %c0_4 = arith.constant 0 : index
    %2 = vector.load %arg2[%c0_2, %c0_3, %c0_4] : memref<3x64x128xf32, #tpu.memory_space<vmem>>, vector<1x64x128xf32>
    %3 = vector.shape_cast %2 : vector<1x64x128xf32> to vector<64x128xf32>
    %cst = arith.constant dense<0.000000e+00> : vector<16x128xf32>
    %4 = tpu.matmul %1, %3, %cst {dimension_numbers = #tpu.dot_dimension_numbers<[1], [0], [0], [1], [0, 0, 1, 1], [], []>} : vector<16x64xf32>, vector<64x128xf32>, vector<16x128xf32> -> vector<16x128xf32>
    %c0_5 = arith.constant 0 : index
    %c1 = arith.constant 1 : index
    %c0_6 = arith.constant 0 : index
    %5 = vector.load %arg1[%c0_5, %c1, %c0_6] : memref<1x18x64xf32, #tpu.memory_space<vmem>>, vector<1x16x64xf32>
    %6 = vector.shape_cast %5 : vector<1x16x64xf32> to vector<16x64xf32>
    %c1_7 = arith.constant 1 : index
    %c0_8 = arith.constant 0 : index
    %c0_9 = arith.constant 0 : index
    %7 = vector.load %arg2[%c1_7, %c0_8, %c0_9] : memref<3x64x128xf32, #tpu.memory_space<vmem>>, vector<1x64x128xf32>
    %8 = vector.shape_cast %7 : vector<1x64x128xf32> to vector<64x128xf32>
    %cst_10 = arith.constant dense<0.000000e+00> : vector<16x128xf32>
    %9 = tpu.matmul %6, %8, %cst_10 {dimension_numbers = #tpu.dot_dimension_numbers<[1], [0], [0], [1], [0, 0, 1, 1], [], []>} : vector<16x64xf32>, vector<64x128xf32>, vector<16x128xf32> -> vector<16x128xf32>
    %10 = arith.addf %4, %9 : vector<16x128xf32>
    %c0_11 = arith.constant 0 : index
    %c2 = arith.constant 2 : index
    %c0_12 = arith.constant 0 : index
    %11 = vector.load %arg1[%c0_11, %c2, %c0_12] : memref<1x18x64xf32, #tpu.memory_space<vmem>>, vector<1x16x64xf32>
    %12 = vector.shape_cast %11 : vector<1x16x64xf32> to vector<16x64xf32>
    %c2_13 = arith.constant 2 : index
    %c0_14 = arith.constant 0 : index
    %c0_15 = arith.constant 0 : index
    %13 = vector.load %arg2[%c2_13, %c0_14, %c0_15] : memref<3x64x128xf32, #tpu.memory_space<vmem>>, vector<1x64x128xf32>
    %14 = vector.shape_cast %13 : vector<1x64x128xf32> to vector<64x128xf32>
    %cst_16 = arith.constant dense<0.000000e+00> : vector<16x128xf32>
    %15 = tpu.matmul %12, %14, %cst_16 {dimension_numbers = #tpu.dot_dimension_numbers<[1], [0], [0], [1], [0, 0, 1, 1], [], []>} : vector<16x64xf32>, vector<64x128xf32>, vector<16x128xf32> -> vector<16x128xf32>
    %16 = arith.addf %10, %15 : vector<16x128xf32>
    %c0_17 = arith.constant 0 : index
    %c0_18 = arith.constant 0 : index
    %17 = vector.load %arg3[%c0_17, %c0_18] : memref<1x128xf32, #tpu.memory_space<vmem>>, vector<1x128xf32>
    %18 = vector.broadcast %17 : vector<1x128xf32> to vector<16x128xf32>
    %19 = arith.addf %16, %18 : vector<16x128xf32>
    %cst_19 = arith.constant 0.000000e+00 : f32
    %20 = vector.broadcast %cst_19 : f32 to vector<16x128xf32>
    %21 = arith.maximumf %19, %20 : vector<16x128xf32>
    %cst_20 = arith.constant 0.000000e+00 : f32
    %22 = vector.broadcast %cst_20 : f32 to vector<1x128xf32>
    %c0_21 = arith.constant 0 : index
    %c0_22 = arith.constant 0 : index
    %23 = vector.load %arg8[%c0_21, %c0_22] : memref<18x128xf32, #tpu.memory_space<vmem>>, vector<1x128xf32>
    tpu.vector_store %arg8[%c0_21, %c0_22], %22 {strides = array<i32>} : memref<18x128xf32, #tpu.memory_space<vmem>>, vector<1x128xf32>,
    %cst_23 = arith.constant 0.000000e+00 : f32
    %24 = vector.broadcast %cst_23 : f32 to vector<1x128xf32>
    %c17 = arith.constant 17 : index
    %c0_24 = arith.constant 0 : index
    %25 = vector.load %arg8[%c17, %c0_24] : memref<18x128xf32, #tpu.memory_space<vmem>>, vector<1x128xf32>
    tpu.vector_store %arg8[%c17, %c0_24], %24 {strides = array<i32>} : memref<18x128xf32, #tpu.memory_space<vmem>>, vector<1x128xf32>,
    %c1_25 = arith.constant 1 : index
    %c0_26 = arith.constant 0 : index
    %26 = vector.load %arg8[%c1_25, %c0_26] : memref<18x128xf32, #tpu.memory_space<vmem>>, vector<16x128xf32>
    tpu.vector_store %arg8[%c1_25, %c0_26], %21 {strides = array<i32>} : memref<18x128xf32, #tpu.memory_space<vmem>>, vector<16x128xf32>,
    %c0_27 = arith.constant 0 : index
    %c0_28 = arith.constant 0 : index
    %27 = vector.load %arg8[%c0_27, %c0_28] : memref<18x128xf32, #tpu.memory_space<vmem>>, vector<16x128xf32>
    %c0_29 = arith.constant 0 : index
    %c0_30 = arith.constant 0 : index
    %c0_31 = arith.constant 0 : index
    %28 = vector.load %arg4[%c0_29, %c0_30, %c0_31] : memref<3x128x128xf32, #tpu.memory_space<vmem>>, vector<1x128x128xf32>
    %29 = vector.shape_cast %28 : vector<1x128x128xf32> to vector<128x128xf32>
    %cst_32 = arith.constant dense<0.000000e+00> : vector<16x128xf32>
    %30 = tpu.matmul %27, %29, %cst_32 {dimension_numbers = #tpu.dot_dimension_numbers<[1], [0], [0], [1], [0, 0, 1, 1], [], []>} : vector<16x128xf32>, vector<128x128xf32>, vector<16x128xf32> -> vector<16x128xf32>
    %c1_33 = arith.constant 1 : index
    %c0_34 = arith.constant 0 : index
    %31 = vector.load %arg8[%c1_33, %c0_34] : memref<18x128xf32, #tpu.memory_space<vmem>>, vector<16x128xf32>
    %c1_35 = arith.constant 1 : index
    %c0_36 = arith.constant 0 : index
    %c0_37 = arith.constant 0 : index
    %32 = vector.load %arg4[%c1_35, %c0_36, %c0_37] : memref<3x128x128xf32, #tpu.memory_space<vmem>>, vector<1x128x128xf32>
    %33 = vector.shape_cast %32 : vector<1x128x128xf32> to vector<128x128xf32>
    %cst_38 = arith.constant dense<0.000000e+00> : vector<16x128xf32>
    %34 = tpu.matmul %31, %33, %cst_38 {dimension_numbers = #tpu.dot_dimension_numbers<[1], [0], [0], [1], [0, 0, 1, 1], [], []>} : vector<16x128xf32>, vector<128x128xf32>, vector<16x128xf32> -> vector<16x128xf32>
    %35 = arith.addf %30, %34 : vector<16x128xf32>
    %c2_39 = arith.constant 2 : index
    %c0_40 = arith.constant 0 : index
    %36 = vector.load %arg8[%c2_39, %c0_40] : memref<18x128xf32, #tpu.memory_space<vmem>>, vector<16x128xf32>
    %c2_41 = arith.constant 2 : index
    %c0_42 = arith.constant 0 : index
    %c0_43 = arith.constant 0 : index
    %37 = vector.load %arg4[%c2_41, %c0_42, %c0_43] : memref<3x128x128xf32, #tpu.memory_space<vmem>>, vector<1x128x128xf32>
    %38 = vector.shape_cast %37 : vector<1x128x128xf32> to vector<128x128xf32>
    %cst_44 = arith.constant dense<0.000000e+00> : vector<16x128xf32>
    %39 = tpu.matmul %36, %38, %cst_44 {dimension_numbers = #tpu.dot_dimension_numbers<[1], [0], [0], [1], [0, 0, 1, 1], [], []>} : vector<16x128xf32>, vector<128x128xf32>, vector<16x128xf32> -> vector<16x128xf32>
    %40 = arith.addf %35, %39 : vector<16x128xf32>
    %c0_45 = arith.constant 0 : index
    %c0_46 = arith.constant 0 : index
    %41 = vector.load %arg5[%c0_45, %c0_46] : memref<1x128xf32, #tpu.memory_space<vmem>>, vector<1x128xf32>
    %42 = vector.broadcast %41 : vector<1x128xf32> to vector<16x128xf32>
    %43 = arith.addf %40, %42 : vector<16x128xf32>
    %c0_47 = arith.constant 0 : index
    %c1_48 = arith.constant 1 : index
    %c0_49 = arith.constant 0 : index
    %44 = vector.load %arg1[%c0_47, %c1_48, %c0_49] : memref<1x18x64xf32, #tpu.memory_space<vmem>>, vector<1x16x64xf32>
    %45 = vector.shape_cast %44 : vector<1x16x64xf32> to vector<16x64xf32>
    %c0_50 = arith.constant 0 : index
    %c0_51 = arith.constant 0 : index
    %46 = vector.load %arg6[%c0_50, %c0_51] : memref<64x128xf32, #tpu.memory_space<vmem>>, vector<64x128xf32>
    %cst_52 = arith.constant dense<0.000000e+00> : vector<16x128xf32>
    %47 = tpu.matmul %45, %46, %cst_52 {dimension_numbers = #tpu.dot_dimension_numbers<[1], [0], [0], [1], [0, 0, 1, 1], [], []>} : vector<16x64xf32>, vector<64x128xf32>, vector<16x128xf32> -> vector<16x128xf32>
    %48 = arith.addf %43, %47 : vector<16x128xf32>
    %cst_53 = arith.constant 0.000000e+00 : f32
    %49 = vector.broadcast %cst_53 : f32 to vector<16x128xf32>
    %50 = arith.maximumf %48, %49 : vector<16x128xf32>
    %c0_54 = arith.constant 0 : index
    %c0_55 = arith.constant 0 : index
    %c0_56 = arith.constant 0 : index
    %51 = vector.load %arg7[%c0_54, %c0_55, %c0_56] : memref<1x16x128xf32, #tpu.memory_space<vmem>>, vector<1x16x128xf32>
    %52 = vector.shape_cast %51 : vector<1x16x128xf32> to vector<16x128xf32>
    %53 = vector.shape_cast %50 : vector<16x128xf32> to vector<1x16x128xf32>
    tpu.vector_store %arg7[%c0_54, %c0_55, %c0_56], %53 {strides = array<i32>} : memref<1x16x128xf32, #tpu.memory_space<vmem>>, vector<1x16x128xf32>,
    return
  }
  func.func @transform_0(%arg0: i32) -> (i32, i32, i32) {
    %c0_i32 = arith.constant 0 : i32
    %c0_i32_0 = arith.constant 0 : i32
    %c0_i32_1 = arith.constant 0 : i32
    return %arg0, %c0_i32, %c0_i32_0 : i32, i32, i32
  }
  func.func @transform_1(%arg0: i32) -> (i32, i32, i32) {
    %c0_i32 = arith.constant 0 : i32
    %c0_i32_0 = arith.constant 0 : i32
    %c0_i32_1 = arith.constant 0 : i32
    %c0_i32_2 = arith.constant 0 : i32
    return %c0_i32, %c0_i32_0, %c0_i32_1 : i32, i32, i32
  }
  func.func @transform_2(%arg0: i32) -> (i32, i32) {
    %c0_i32 = arith.constant 0 : i32
    %c0_i32_0 = arith.constant 0 : i32
    %c0_i32_1 = arith.constant 0 : i32
    return %c0_i32, %c0_i32_0 : i32, i32
  }
  func.func @transform_3(%arg0: i32) -> (i32, i32, i32) {
    %c0_i32 = arith.constant 0 : i32
    %c0_i32_0 = arith.constant 0 : i32
    %c0_i32_1 = arith.constant 0 : i32
    %c0_i32_2 = arith.constant 0 : i32
    return %c0_i32, %c0_i32_0, %c0_i32_1 : i32, i32, i32
  }
  func.func @transform_4(%arg0: i32) -> (i32, i32) {
    %c0_i32 = arith.constant 0 : i32
    %c0_i32_0 = arith.constant 0 : i32
    %c0_i32_1 = arith.constant 0 : i32
    return %c0_i32, %c0_i32_0 : i32, i32
  }
  func.func @transform_5(%arg0: i32) -> (i32, i32) {
    %c0_i32 = arith.constant 0 : i32
    %c0_i32_0 = arith.constant 0 : i32
    %c0_i32_1 = arith.constant 0 : i32
    return %c0_i32, %c0_i32_0 : i32, i32
  }
  func.func @transform_6(%arg0: i32) -> (i32, i32, i32) {
    %c0_i32 = arith.constant 0 : i32
    %c0_i32_0 = arith.constant 0 : i32
    %c0_i32_1 = arith.constant 0 : i32
    return %arg0, %c0_i32, %c0_i32_0 : i32, i32, i32
  }
}

</mosaic_0001>

<bundles_post_ra>
// kernel: tile.13
= control target key start
LH: loop header
LB: loop body
LE: loop exit
PB: predicated region body
PF: predicated region fallthrough
CT: control target
= control target key end

     0   :  { %s28_s0 = inlined_call_operand.vmem [shape: f32[8], index: 0, kind: input, shape index: {}]   ;;  %s29_s1 = inlined_call_operand.vmem [shape: f32[16,8], index: 1, kind: output, shape index: {}]  }
   0x1   :  { %v4_v0 = vld [vmem:[%s28_s0] ss:$0 sm:$0xff] }
   0x2   :  { %5 = vst [vmem:[%s29_s1] sm:$0xff] %v4_v0  ;;  %8 = vst [vmem:[%s29_s1 + $0x8] sm:$0xff] %v4_v0 }

// kernel: tile.14
= control target key start
LH: loop header
LB: loop body
LE: loop exit
PB: predicated region body
PF: predicated region fallthrough
CT: control target
= control target key end

     0   :  { %s131_s10 = smov 120   ;;  %s132_s11 = smov 104   ;;  %vm3_vm0 = vcmask 64512   ;;  %vm9_vm1 = vcmask 1048512   ;;  %vm15_vm2 = vcmask 982912   ;;  %vm21_vm3 = vcmask 917312   ;;  %s207_s0 = inlined_call_operand.vmem [shape: f32[16,8], index: 0, kind: input, shape index: {}]   ;;  %s208_s1 = inlined_call_operand.vmem [shape: f32[1,128], index: 1, kind: output, shape index: {}]  }
   0x1   :  { %v101_v0 = vld [vmem:[%s207_s0 + $0xf] sm:$0x1]   ;;  %v103_v1 = vld [vmem:[%s207_s0 + $0xd] sm:$0x1]   ;;  %v102_v2 = vld [vmem:[%s207_s0 + $0xe] sm:$0x1]  }
   0x2   :  { %7 = vrot.lane.b32.xlu0 %v101_v0, %s131_s10  ;;  %19 = vrot.lane.b32.xlu1 %v103_v1, %s132_s11  ;;  %v104_v3 = vld [vmem:[%s207_s0 + $0xc] sm:$0x1]   ;;  %s133_s16 = smov 112   ;;  %s134_s17 = smov 96   ;;  %v105_v4 = vld [vmem:[%s207_s0 + $0xb] sm:$0x1]  }
   0x3   :  { %v106_v5 = vld [vmem:[%s207_s0 + $0xa] sm:$0x1]   ;;  %v2_v6 = vld [vmem:[%s207_s0] sm:$0x1]   ;;  %s135_s24 = smov 88   ;;  %s136_s25 = smov 80  }
   0x4   :  { %4 = vst.msk [vmem:[#allocation0] sm:$0x1] %vm3_vm0, %v2_v6   ;;  %v107_v7 = vld [vmem:[%s207_s0 + $0x9] sm:$0x1]   ;;  %v108_v8 = vld [vmem:[%s207_s0 + $0x8] sm:$0x1]  }
   0x5   :  { %s137_s30 = smov 72   ;;  %s138_s2 = smov 64   ;;  %v109_v9 = vld [vmem:[%s207_s0 + $0x7] sm:$0x1]   ;;  %v110_v10 = vld [vmem:[%s207_s0 + $0x6] sm:$0x1]  }
   0x6   :  { %13 = vrot.lane.b32.xlu0 %v102_v2, %s133_s16  ;;  %25 = vrot.lane.b32.xlu1 %v104_v3, %s134_s17  ;;  %s139_s7 = smov 56   ;;  %s140_s8 = smov 48   ;;  %v111_v11 = vld [vmem:[%s207_s0 + $0x5] sm:$0x1]   ;;  %v112_v12 = vld [vmem:[%s207_s0 + $0x4] sm:$0x1]  }
   0x7   :  { %s141_s13 = smov 40   ;;  %s142_s14 = smov 32   ;;  %v113_v13 = vld [vmem:[%s207_s0 + $0x3] sm:$0x1]   ;;  %v114_v14 = vld [vmem:[%s207_s0 + $0x2] sm:$0x1]  }
   0x8   :  { %s143_s19 = smov 24   ;;  %s144_s20 = smov 16   ;;  %v115_v15 = vld [vmem:[%s207_s0 + $0x1] sm:$0x1]   ;;  %vm27_vm4 = vcmask 851712   ;;  %vm33_vm5 = vcmask 786112  }
   0x9   :  { %s145_s0 = smov 8   ;;  %vm39_vm6 = vcmask 720512   ;;  %vm45_vm7 = vcmask 654912   ;;  %vm51_vm8 = vcmask 589312   ;;  %vm57_vm9 = vcmask 523712  }
   0xa   :  { %31 = vrot.lane.b32.xlu0 %v105_v4, %s135_s24  ;;  %37 = vrot.lane.b32.xlu1 %v106_v5, %s136_s25  ;;  %vm63_vm10 = vcmask 458112   ;;  %vm69_vm11 = vcmask 392512   ;;  %vm75_vm12 = vcmask 326912   ;;  %vm81_vm13 = vcmask 261312  }
   0xb   :  { %vm87_vm14 = vcmask 195712   ;;  %vm93_vm15 = vcmask 130112  }
   0xe   :  { %43 = vrot.lane.b32.xlu0 %v107_v7, %s137_s30  ;;  %49 = vrot.lane.b32.xlu1 %v108_v8, %s138_s2 }
  0x12   :  { %55 = vrot.lane.b32.xlu0 %v109_v9, %s139_s7  ;;  %61 = vrot.lane.b32.xlu1 %v110_v10, %s140_s8 }
  0x16   :  { %67 = vrot.lane.b32.xlu0 %v111_v11, %s141_s13  ;;  %73 = vrot.lane.b32.xlu1 %v112_v12, %s142_s14 }
  0x1a   :  { %79 = vrot.lane.b32.xlu0 %v113_v13, %s143_s19  ;;  %85 = vrot.lane.b32.xlu1 %v114_v14, %s144_s20 }
  0x1e   :  { %91 = vrot.lane.b32.xlu0 %v115_v15, %s145_s0 }
  0x74   :  { %v8_v16 = vpop.permute.xlu0 %7   ;;  %v20_v17 = vpop.permute.xlu1 %19  }
  0x75   :  { %10 = vst.msk [vmem:[#allocation0] sm:$0x1] %vm9_vm1, %v8_v16  }
  0x78   :  { %v14_v18 = vpop.permute.xlu0 %13   ;;  %v26_v19 = vpop.permute.xlu1 %25  }
  0x79   :  { %16 = vst.msk [vmem:[#allocation0] sm:$0x1] %vm15_vm2, %v14_v18  }
  0x7a   :  { %22 = vst.msk [vmem:[#allocation0] sm:$0x1] %vm21_vm3, %v20_v17  }
  0x7b   :  { %28 = vst.msk [vmem:[#allocation0] sm:$0x1] %vm27_vm4, %v26_v19  }
  0x7c   :  { %v32_v20 = vpop.permute.xlu0 %31   ;;  %v38_v21 = vpop.permute.xlu1 %37  }
  0x7d   :  { %34 = vst.msk [vmem:[#allocation0] sm:$0x1] %vm33_vm5, %v32_v20  }
  0x7e   :  { %40 = vst.msk [vmem:[#allocation0] sm:$0x1] %vm39_vm6, %v38_v21  }
  0x80   :  { %v44_v22 = vpop.permute.xlu0 %43   ;;  %v50_v23 = vpop.permute.xlu1 %49  }
  0x81   :  { %46 = vst.msk [vmem:[#allocation0] sm:$0x1] %vm45_vm7, %v44_v22  }
  0x82   :  { %52 = vst.msk [vmem:[#allocation0] sm:$0x1] %vm51_vm8, %v50_v23  }
  0x84   :  { %v56_v24 = vpop.permute.xlu0 %55   ;;  %v62_v25 = vpop.permute.xlu1 %61  }
  0x85   :  { %58 = vst.msk [vmem:[#allocation0] sm:$0x1] %vm57_vm9, %v56_v24  }
  0x86   :  { %64 = vst.msk [vmem:[#allocation0] sm:$0x1] %vm63_vm10, %v62_v25  }
  0x88   :  { %v68_v26 = vpop.permute.xlu0 %67   ;;  %v74_v27 = vpop.permute.xlu1 %73  }
  0x89   :  { %70 = vst.msk [vmem:[#allocation0] sm:$0x1] %vm69_vm11, %v68_v26  }
  0x8a   :  { %76 = vst.msk [vmem:[#allocation0] sm:$0x1] %vm75_vm12, %v74_v27  }
  0x8c   :  { %v80_v28 = vpop.permute.xlu0 %79   ;;  %v86_v29 = vpop.permute.xlu1 %85  }
  0x8d   :  { %82 = vst.msk [vmem:[#allocation0] sm:$0x1] %vm81_vm13, %v80_v28  }
  0x8e   :  { %88 = vst.msk [vmem:[#allocation0] sm:$0x1] %vm87_vm14, %v86_v29  }
  0x90   :  { %v92_v30 = vpop.permute.xlu0 %91  }
  0x91   :  { %94 = vst.msk [vmem:[#allocation0] sm:$0x1] %vm93_vm15, %v92_v30  }
  0x98   :  { %v98_v31 = vld [vmem:[#allocation0] sm:$0x1] }
  0x99   :  { %100 = vst [vmem:[%s208_s1] sm:$0x1] %v98_v31 }

// kernel: residual_block_forward.1
= control target key start
LH: loop header
LB: loop body
LE: loop exit
PB: predicated region body
PF: predicated region fallthrough
CT: control target
= control target key end

     0   :  { %s1559_s21 = smov 0   ;;  %s1850_s0 = inlined_call_operand.vmem [shape: f32[2,18,64], index: 0, kind: input, shape index: {}]   ;;  %s1851_s1 = inlined_call_operand.vmem [shape: f32[3,64,128], index: 1, kind: input, shape index: {}]   ;;  %s1852_s2 = inlined_call_operand.vmem [shape: f32[1,128], index: 2, kind: input, shape index: {}]   ;;  %s1853_s3 = inlined_call_operand.vmem [shape: f32[3,128,128], index: 3, kind: input, shape index: {}]   ;;  %s1854_s4 = inlined_call_operand.vmem [shape: f32[1,128], index: 4, kind: input, shape index: {}]   ;;  %s1855_s5 = inlined_call_operand.vmem [shape: f32[64,128], index: 5, kind: input, shape index: {}]   ;;  %s1856_s6 = inlined_call_operand.vmem [shape: f32[2,16,128], index: 6, kind: output, shape index: {}]  }
   0x1 LB: > { %s989_s22 = sadd.s32 4294967295, %s1521_s21   ;;  %p993_p0 = scmp.ge.s32.totalorder %s1521_s21, 1  ;;  %s1521_s21 = sphi %s1559_s21, %s16_s21  }
   0x2   : > { %p212_p1 = scmp.lt.s32.totalorder %s1521_s21, 3 }
   0x4   : > { %p213_p2 = pnand %p993_p0, %p212_p1 }
   0x5   : > { %v997_v0 = vld [vmem:[%s1851_s1 + $0x40] sm:$0xff] (!%p213_p2)  ;;  %v998_v1 = vld [vmem:[%s1851_s1 + $0x48] sm:$0xff] (!%p213_p2)  ;;  %v999_v2 = vld [vmem:[%s1851_s1 + $0x50] sm:$0xff] (!%p213_p2)  ;;  %p242_p3 = scmp.lt.s32.totalorder (!%p213_p2), %s989_s22, 1  ;;  %vm273_vm0 = vcmask (!%p213_p2), 523264  }
   0x6   : > { %216 = sbr.rel (%p213_p2) target bundleno = 548 (0x224), region = 44  ;;  %v1333_v3 = vpack.c.bf16 (!%p213_p2), %v998_v1, %v997_v0  ;;  %v1000_v4 = vld [vmem:[%s1851_s1 + $0x58] sm:$0xff] (!%p213_p2)  ;;  %v1001_v6 = vld [vmem:[%s1851_s1 + $0x60] sm:$0xff] (!%p213_p2)  ;;  %v1002_v7 = vld [vmem:[%s1851_s1 + $0x68] sm:$0xff] (!%p213_p2) }
   0x7   : > { %v1337_v5 = vpack.c.bf16 (!%p213_p2), %v1000_v4, %v999_v2  ;;  %v1341_v8 = vpack.c.bf16 (!%p213_p2), %v1002_v7, %v1001_v6  ;;  %v1003_v9 = vld [vmem:[%s1851_s1 + $0x70] sm:$0xff] (!%p213_p2)  ;;  %v1004_v10 = vld [vmem:[%s1851_s1 + $0x78] sm:$0xff] (!%p213_p2)  ;;  %v254_v13 = vld [vmem:[%s1851_s1] sm:$0xff] (!%p213_p2) }
   0x8   : > { %1334 = vmatprep.subr.bf16.mxu0 (!%p213_p2), %v1333_v3  ;;  %v1345_v12 = vpack.c.bf16 (!%p213_p2), %v1004_v10, %v1003_v9  ;;  %v255_v14 = vld [vmem:[%s1851_s1 + $0x8] sm:$0xff] (!%p213_p2)  ;;  %v547_v15 = vld [vmem:[%s1853_s3] sm:$0xff] (!%p213_p2)  ;;  %v549_v18 = vld [vmem:[%s1853_s3 + $0x10] sm:$0xff] (!%p213_p2) }
   0x9   : > { %1336 = vmatpush3.bf16.msra.mxu0 (!%p213_p2), %v1333_v3  ;;  %v548_v16 = vld [vmem:[%s1853_s3 + $0x8] sm:$0xff] (!%p213_p2)  ;;  %v550_v19 = vld [vmem:[%s1853_s3 + $0x18] sm:$0xff] (!%p213_p2)  ;;  %v551_v21 = vld [vmem:[%s1853_s3 + $0x20] sm:$0xff] (!%p213_p2)  ;;  %v1349_v22 = vpack.c.bf16 (!%p213_p2), %v255_v14, %v254_v13 }
   0xa   : > { %1338 = vmatprep.subr.bf16.mxu0 (!%p213_p2), %v1337_v5  ;;  %v1413_v17 = vpack.c.bf16 (!%p213_p2), %v548_v16, %v547_v15  ;;  %v1417_v20 = vpack.c.bf16 (!%p213_p2), %v550_v19, %v549_v18  ;;  %v552_v23 = vld [vmem:[%s1853_s3 + $0x28] sm:$0xff] (!%p213_p2)  ;;  %v256_v24 = vld [vmem:[%s1851_s1 + $0x10] sm:$0xff] (!%p213_p2)  ;;  %v257_v25 = vld [vmem:[%s1851_s1 + $0x18] sm:$0xff] (!%p213_p2) }
   0xb   : > { %v1421_v26 = vpack.c.bf16 (!%p213_p2), %v552_v23, %v551_v21  ;;  %v553_v28 = vld [vmem:[%s1853_s3 + $0x30] sm:$0xff] (!%p213_p2)  ;;  %v554_v29 = vld [vmem:[%s1853_s3 + $0x38] sm:$0xff] (!%p213_p2)  ;;  %v1353_v30 = vpack.c.bf16 (!%p213_p2), %v257_v25, %v256_v24  ;;  %v258_v32 = vld [vmem:[%s1851_s1 + $0x20] sm:$0xff] (!%p213_p2)  ;;  %v1523_v24 = vmov (!%p213_p2), 0.0  }
   0xc   : > { %1414 = vmatprep.subr.bf16.mxu1 (!%p213_p2), %v1413_v17  ;;  %v259_v33 = vld [vmem:[%s1851_s1 + $0x28] sm:$0xff] (!%p213_p2)  ;;  %v1425_v34 = vpack.c.bf16 (!%p213_p2), %v554_v29, %v553_v28  ;;  %v555_v35 = vld [vmem:[%s1853_s3 + $0x40] sm:$0xff] (!%p213_p2)  ;;  %v260_v38 = vld [vmem:[%s1851_s1 + $0x30] sm:$0xff] (!%p213_p2)  ;;  %541 = vst [vmem:[#allocation2] sm:$0x1] (!%p213_p2), %v1523_v24 }
   0xd   : > { %s1858_s22 = smov (!%p242_p3, %s989_s22), 1  ;;  %1340 = vmatpush3.bf16.msra.mxu0 %v1337_v5  ;;  %1416 = vmatpush3.bf16.msra.mxu1 %v1413_v17  ;;  %v556_v36 = vld [vmem:[%s1853_s3 + $0x48] sm:$0xff]  ;;  %v1357_v37 = vpack.c.bf16 %v259_v33, %v258_v32  ;;  %v261_v39 = vld [vmem:[%s1851_s1 + $0x38] sm:$0xff]  ;;  %v1009_v42 = vld [vmem:[%s1851_s1 + $0x80] sm:$0xff]  ;;  %542 = vst [vmem:[#allocation2 + $0x11] sm:$0x1] %v1523_v24 }
   0xe   : > { %s1505_s11 = smul.u32 24, %s1858_s22  ;;  %1342 = vmatprep.subr.bf16.mxu0 %v1341_v8  ;;  %1418 = vmatprep.subr.bf16.mxu1 %v1417_v20  ;;  %v1429_v40 = vpack.c.bf16 %v556_v36, %v555_v35  ;;  %v1361_v41 = vpack.c.bf16 %v261_v39, %v260_v38  ;;  %v1010_v43 = vld [vmem:[%s1851_s1 + $0x88] sm:$0xff]  ;;  %v1011_v45 = vld [vmem:[%s1851_s1 + $0x90] sm:$0xff]  ;;  %v1012_v46 = vld [vmem:[%s1851_s1 + $0x98] sm:$0xff]  ;;  %s1057_s15 = sshll.u32 %s1858_s22, 4 }
   0xf   : > { %v1365_v44 = vpack.c.bf16 %v1010_v43, %v1009_v42  ;;  %v1369_v48 = vpack.c.bf16 %v1012_v46, %v1011_v45  ;;  %v1013_v50 = vld [vmem:[%s1851_s1 + $0xa0] sm:$0xff]  ;;  %v1014_v51 = vld [vmem:[%s1851_s1 + $0xa8] sm:$0xff]  ;;  %v1015_v53 = vld [vmem:[%s1851_s1 + $0xb0] sm:$0xff]  ;;  %s251_s19 = scalar_lea.vmem %s1856_s6, %s1057_s15 }
  0x10   : > { %s1597_s18 = scalar_lea.vmem %s1850_s0, %s1505_s11  ;;  %v1373_v52 = vpack.c.bf16 %v1014_v51, %v1013_v50  ;;  %v1016_v54 = vld [vmem:[%s1851_s1 + $0xb8] sm:$0xff]  ;;  %v1020_v56 = vld [vmem:[%s1853_s3 + $0x80] sm:$0xff]  ;;  %v1021_v57 = vld [vmem:[%s1853_s3 + $0x88] sm:$0xff] }
  0x11   : > { %v1600_v11 = vld [vmem:[%s1597_s18 + $0x1] sm:$0xff]  ;;  %1344 = vmatpush3.bf16.msra.mxu0 %v1341_v8  ;;  %v1635_v27 = vld [vmem:[%s1597_s18 + $0x9] sm:$0xff]  ;;  %1420 = vmatpush3.bf16.msra.mxu1 %v1417_v20  ;;  %v1377_v55 = vpack.c.bf16 %v1016_v54, %v1015_v53  ;;  %v1381_v58 = vpack.c.bf16 %v1021_v57, %v1020_v56  ;;  %v1023_v60 = vld [vmem:[%s1853_s3 + $0x98] sm:$0xff] }
  0x12   : > { %1168 = vmatprep.mubr.msk.f32.mxu0 %vm273_vm0, %v1600_v11  ;;  %1346 = vmatprep.subr.bf16.mxu0 %v1345_v12  ;;  %v252_v31 = vld [vmem:[%s1597_s18] sm:$0xff]  ;;  %v253_v47 = vld [vmem:[%s1597_s18 + $0x8] sm:$0xff]  ;;  %v1022_v59 = vld [vmem:[%s1853_s3 + $0x90] sm:$0xff] }
  0x13   : > { %1422 = vmatprep.subr.bf16.mxu1 %v1421_v26  ;;  %v436_v49 = vld [vmem:[%s1597_s18 + $0x2] sm:$0xff]  ;;  %v437_v61 = vld [vmem:[%s1597_s18 + $0xa] sm:$0xff]  ;;  %v1385_v62 = vpack.c.bf16 %v1023_v60, %v1022_v59  ;;  %v1027_v3 = vld [vmem:[%s1853_s3 + $0xb8] sm:$0xff] }
  0x14   : > { %v1024_v63 = vld [vmem:[%s1853_s3 + $0xa0] sm:$0xff]  ;;  %v1025_v0 = vld [vmem:[%s1853_s3 + $0xa8] sm:$0xff]  ;;  %v1026_v2 = vld [vmem:[%s1853_s3 + $0xb0] sm:$0xff] }
  0x15   : > { %1348 = vmatpush3.bf16.msra.mxu0 %v1345_v12  ;;  %1424 = vmatpush3.bf16.msra.mxu1 %v1421_v26  ;;  %v1389_v1 = vpack.c.bf16 %v1025_v0, %v1024_v63  ;;  %v1393_v4 = vpack.c.bf16 %v1027_v3, %v1026_v2  ;;  %v1028_v5 = vld [vmem:[%s1853_s3 + $0xc0] sm:$0xff]  ;;  %v1029_v6 = vld [vmem:[%s1853_s3 + $0xc8] sm:$0xff]  ;;  %v1030_v8 = vld [vmem:[%s1853_s3 + $0xd0] sm:$0xff] }
  0x16   : > { %1350 = vmatprep.subr.bf16.mxu0 %v1349_v22  ;;  %1426 = vmatprep.subr.bf16.mxu1 %v1425_v34  ;;  %v1397_v7 = vpack.c.bf16 %v1029_v6, %v1028_v5  ;;  %v1031_v9 = vld [vmem:[%s1853_s3 + $0xd8] sm:$0xff]  ;;  %v1032_v12 = vld [vmem:[%s1853_s3 + $0xe0] sm:$0xff]  ;;  %v1033_v13 = vld [vmem:[%s1853_s3 + $0xe8] sm:$0xff] }
  0x17   : > { %v1401_v10 = vpack.c.bf16 %v1031_v9, %v1030_v8  ;;  %v1405_v14 = vpack.c.bf16 %v1033_v13, %v1032_v12  ;;  %v557_v15 = vld [vmem:[%s1853_s3 + $0x50] sm:$0xff]  ;;  %v558_v16 = vld [vmem:[%s1853_s3 + $0x58] sm:$0xff]  ;;  %v559_v21 = vld [vmem:[%s1853_s3 + $0x60] sm:$0xff] }
  0x18   : > { %1169 = vmatmul.mubr.msk.f32.vlgmr.msra.gmra.mrb[0].mxu0 %vm273_vm0, %v1635_v27  ;;  %v1433_v17 = vpack.c.bf16 %v558_v16, %v557_v15  ;;  %v1034_v18 = vld [vmem:[%s1853_s3 + $0xf0] sm:$0xff]  ;;  %v1035_v19 = vld [vmem:[%s1853_s3 + $0xf8] sm:$0xff]  ;;  %v1036_v29 = vld [vmem:[%s1853_s3 + $0x100] sm:$0xff] }
  0x19   : > { %1352 = vmatpush3.bf16.msra.mxu0 %v1349_v22  ;;  %1187 = vmatprep.mubr.msk.f32.mxu0 %vm273_vm0, %v252_v31  ;;  %v1409_v20 = vpack.c.bf16 %v1035_v19, %v1034_v18  ;;  %v560_v22 = vld [vmem:[%s1853_s3 + $0x68] sm:$0xff]  ;;  %v561_v25 = vld [vmem:[%s1853_s3 + $0x70] sm:$0xff]  ;;  %v562_v26 = vld [vmem:[%s1853_s3 + $0x78] sm:$0xff] }
  0x1a   : > { %1354 = vmatprep.subr.bf16.mxu0 %v1353_v30  ;;  %1428 = vmatpush3.bf16.msra.mxu1 %v1425_v34  ;;  %v1437_v23 = vpack.c.bf16 %v560_v22, %v559_v21  ;;  %v1441_v28 = vpack.c.bf16 %v562_v26, %v561_v25  ;;  %v1019_v32 = vld [vmem:[%s1852_s2] ss:$0 sm:$0xff]  ;;  %v1038_v39 = vld [vmem:[%s1853_s3 + $0x110] sm:$0xff]  ;;  %v1041_v45 = vld [vmem:[%s1853_s3 + $0x128] sm:$0xff] }
  0x1b   : > { %1430 = vmatprep.subr.bf16.mxu1 %v1429_v40  ;;  %v1044_v51 = vld [vmem:[%s1853_s3 + $0x140] sm:$0xff]  ;;  %v1046_v54 = vld [vmem:[%s1853_s3 + $0x150] sm:$0xff]  ;;  %v840_v0 = vld [vmem:[%s1855_s5 + $0x8] sm:$0xff] }
  0x1c   : > { %v1048_v57 = vld [vmem:[%s1853_s3 + $0x160] sm:$0xff]  ;;  %v1050_v60 = vld [vmem:[%s1853_s3 + $0x170] sm:$0xff]  ;;  %v842_v3 = vld [vmem:[%s1855_s5 + $0x18] sm:$0xff] }
  0x1d   : > { %1356 = vmatpush3.bf16.msra.mxu0 %v1353_v30  ;;  %v1037_v30 = vld [vmem:[%s1853_s3 + $0x108] sm:$0xff]  ;;  %v839_v63 = vld [vmem:[%s1855_s5] sm:$0xff]  ;;  %v841_v2 = vld [vmem:[%s1855_s5 + $0x10] sm:$0xff] }
  0x1e   : > { %1358 = vmatprep.subr.bf16.mxu0 %v1357_v37  ;;  %1432 = vmatpush3.bf16.msra.mxu1 %v1429_v40  ;;  %v1445_v31 = vpack.c.bf16 %v1037_v30, %v1036_v29  ;;  %v1039_v40 = vld [vmem:[%s1853_s3 + $0x118] sm:$0xff]  ;;  %v843_v6 = vld [vmem:[%s1855_s5 + $0x20] sm:$0xff]  ;;  %v845_v9 = vld [vmem:[%s1855_s5 + $0x30] sm:$0xff] }
  0x1f   : > { %1434 = vmatprep.subr.bf16.mxu1 %v1433_v17  ;;  %v1449_v43 = vpack.c.bf16 %v1039_v40, %v1038_v39 }
  0x21   : > { %1360 = vmatpush3.bf16.msra.mxu0 %v1357_v37 }
  0x22   : > { %1362 = vmatprep.subr.bf16.mxu0 %v1361_v41  ;;  %1436 = vmatpush3.bf16.msra.mxu1 %v1433_v17 }
  0x23   : > { %1438 = vmatprep.subr.bf16.mxu1 %v1437_v23 }
  0x25   : > { %1364 = vmatpush3.bf16.msra.mxu0 %v1361_v41 }
  0x26   : > { %1366 = vmatprep.subr.bf16.mxu0 %v1365_v44  ;;  %1440 = vmatpush3.bf16.msra.mxu1 %v1437_v23 }
  0x27   : > { %1442 = vmatprep.subr.bf16.mxu1 %v1441_v28 }
  0x28   : > { %1188 = vmatmul.mubr.msk.f32.vlgmr.msra.gmra.mrb[0].mxu0 %vm273_vm0, %v253_v47 }
  0x29   : > { %1368 = vmatpush3.bf16.msra.mxu0 %v1365_v44  ;;  %1206 = vmatprep.mubr.msk.f32.mxu0 %vm273_vm0, %v436_v49  ;;  %v1040_v44 = vld [vmem:[%s1853_s3 + $0x120] sm:$0xff]  ;;  %v1043_v49 = vld [vmem:[%s1853_s3 + $0x138] sm:$0xff] }
  0x2a   : > { %1370 = vmatprep.subr.bf16.mxu0 %v1369_v48  ;;  %1444 = vmatpush3.bf16.msra.mxu1 %v1441_v28  ;;  %v1453_v47 = vpack.c.bf16 %v1041_v45, %v1040_v44 }
  0x2b   : > { %1446 = vmatprep.subr.bf16.mxu1 %v1445_v31 }
  0x2d   : > { %1372 = vmatpush3.bf16.msra.mxu0 %v1369_v48  ;;  %v1042_v48 = vld [vmem:[%s1853_s3 + $0x130] sm:$0xff] }
  0x2e   : > { %1374 = vmatprep.subr.bf16.mxu0 %v1373_v52  ;;  %v1457_v50 = vpack.c.bf16 %v1043_v49, %v1042_v48 }
  0x31   : > { %1376 = vmatpush3.bf16.msra.mxu0 %v1373_v52  ;;  %v1045_v52 = vld [vmem:[%s1853_s3 + $0x148] sm:$0xff] }
  0x32   : > { %1378 = vmatprep.subr.bf16.mxu0 %v1377_v55  ;;  %v1461_v53 = vpack.c.bf16 %v1045_v52, %v1044_v51 }
  0x35   : > { %1380 = vmatpush3.bf16.msra.mxu0 %v1377_v55  ;;  %v1047_v55 = vld [vmem:[%s1853_s3 + $0x158] sm:$0xff] }
  0x36   : > { %1382 = vmatprep.subr.bf16.mxu0 %v1381_v58  ;;  %v1465_v56 = vpack.c.bf16 %v1047_v55, %v1046_v54 }
  0x38   : > { %1207 = vmatmul.mubr.msk.f32.vlgmr.msra.gmra.mrb[0].mxu0 %vm273_vm0, %v437_v61  ;;  %v1051_v61 = vld [vmem:[%s1853_s3 + $0x178] sm:$0xff] }
  0x39   : > { %1384 = vmatpush3.bf16.msra.mxu0 %v1381_v58  ;;  %v1049_v58 = vld [vmem:[%s1853_s3 + $0x168] sm:$0xff] }
  0x3a   : > { %1386 = vmatprep.subr.bf16.mxu0 %v1385_v62  ;;  %v1469_v59 = vpack.c.bf16 %v1049_v58, %v1048_v57 }
  0x3d   : > { %1388 = vmatpush3.bf16.msra.mxu0 %v1385_v62  ;;  %v1473_v62 = vpack.c.bf16 %v1051_v61, %v1050_v60 }
  0x3e   : > { %1390 = vmatprep.subr.bf16.mxu0 %v1389_v1 }
  0x41   : > { %1392 = vmatpush3.bf16.msra.mxu0 %v1389_v1  ;;  %v1477_v1 = vpack.c.bf16 %v840_v0, %v839_v63 }
  0x42   : > { %1394 = vmatprep.subr.bf16.mxu0 %v1393_v4 }
  0x45   : > { %1396 = vmatpush3.bf16.msra.mxu0 %v1393_v4  ;;  %v1481_v4 = vpack.c.bf16 %v842_v3, %v841_v2 }
  0x46   : > { %1398 = vmatprep.subr.bf16.mxu0 %v1397_v7 }
  0x49   : > { %1400 = vmatpush3.bf16.msra.mxu0 %v1397_v7  ;;  %v844_v7 = vld [vmem:[%s1855_s5 + $0x28] sm:$0xff] }
  0x4a   : > { %1402 = vmatprep.subr.bf16.mxu0 %v1401_v10  ;;  %v1485_v8 = vpack.c.bf16 %v844_v7, %v843_v6 }
  0x4d   : > { %1404 = vmatpush3.bf16.msra.mxu0 %v1401_v10  ;;  %v846_v10 = vld [vmem:[%s1855_s5 + $0x38] sm:$0xff] }
  0x4e   : > { %1406 = vmatprep.subr.bf16.mxu0 %v1405_v14  ;;  %v1489_v12 = vpack.c.bf16 %v846_v10, %v845_v9 }
  0x51   : > { %1408 = vmatpush3.bf16.msra.mxu0 %v1405_v14  ;;  %v1052_v14 = vld [vmem:[%s1854_s4] ss:$0 sm:$0xff] }
  0x52   : > { %1410 = vmatprep.subr.bf16.mxu0 %v1409_v20 }
  0x55   : > { %1412 = vmatpush3.bf16.msra.mxu0 %v1409_v20 }
 0x10b   : > { %v1208_v33 = vpop.f32.mrb[0].mxu0 }
 0x10c   : > { %v538_v34 = vadd.f32 %v1208_v33, %v1019_v32  ;;  %v519_v35 = vpop.f32.mrb[1].mxu0 }
 0x10d   : > { %v537_v36 = vadd.f32 %v1019_v32, %v519_v35 }
 0x10e   : > { %v540_v37 = vmax.f32 %v538_v34, 0.0 }
 0x10f   : > { %v539_v38 = vmax.f32 %v537_v36, 0.0 }
 0x110   : > { %544 = vst [vmem:[#allocation2 + $0x9] sm:$0xff] %v540_v37 }
 0x111   : > { %543 = vst [vmem:[#allocation2 + $0x1] sm:$0xff] %v539_v38  ;;  %1241 = vmatprep.mubr.f32.mxu0 %v539_v38 }
 0x112   : > { %1242 = vmatmul.mubr.f32.vlgmr.msra.gmra.mrb[2].mxu0 %v540_v37 }
 0x117   : > { %v733_v5 = vld [vmem:[#allocation2 + $0xa] sm:$0xff] }
 0x118   : > { %v545_v41 = vld [vmem:[#allocation2] sm:$0xff]  ;;  %v546_v42 = vld [vmem:[#allocation2 + $0x8] sm:$0xff] }
 0x119   : > { %1276 = vmatprep.mubr.f32.mxu1 %v545_v41  ;;  %v732_v46 = vld [vmem:[#allocation2 + $0x2] sm:$0xff] }
 0x11a   : > { %1277 = vmatmul.mubr.f32.vlgmr.msra.gmra.mrb[0].mxu1 %v546_v42 }
 0x11b   : > { %1448 = vmatpush3.bf16.msra.mxu1 %v1445_v31  ;;  %1311 = vmatprep.mubr.f32.mxu1 %v732_v46 }
 0x11c   : > { %1450 = vmatprep.subr.bf16.mxu1 %v1449_v43 }
 0x11f   : > { %1452 = vmatpush3.bf16.msra.mxu1 %v1449_v43 }
 0x120   : > { %1454 = vmatprep.subr.bf16.mxu1 %v1453_v47 }
 0x123   : > { %1456 = vmatpush3.bf16.msra.mxu1 %v1453_v47 }
 0x124   : > { %1458 = vmatprep.subr.bf16.mxu1 %v1457_v50 }
 0x127   : > { %1460 = vmatpush3.bf16.msra.mxu1 %v1457_v50 }
 0x128   : > { %1462 = vmatprep.subr.bf16.mxu1 %v1461_v53 }
 0x12b   : > { %1464 = vmatpush3.bf16.msra.mxu1 %v1461_v53 }
 0x12c   : > { %1466 = vmatprep.subr.bf16.mxu1 %v1465_v56 }
 0x12f   : > { %1468 = vmatpush3.bf16.msra.mxu1 %v1465_v56 }
 0x130   : > { %1470 = vmatprep.subr.bf16.mxu1 %v1469_v59 }
 0x133   : > { %1472 = vmatpush3.bf16.msra.mxu1 %v1469_v59 }
 0x134   : > { %1474 = vmatprep.subr.bf16.mxu1 %v1473_v62 }
 0x137   : > { %1476 = vmatpush3.bf16.msra.mxu1 %v1473_v62 }
 0x138   : > { %1478 = vmatprep.subr.bf16.mxu1 %v1477_v1 }
 0x13a   : > { %1312 = vmatmul.mubr.f32.vlgmr.msra.gmra.mrb[0].mxu1 %v733_v5 }
 0x13b   : > { %1480 = vmatpush3.bf16.msra.mxu1 %v1477_v1  ;;  %1330 = vmatprep.mubr.msk.f32.mxu1 %vm273_vm0, %v1600_v11 }
 0x13c   : > { %1482 = vmatprep.subr.bf16.mxu1 %v1481_v4 }
 0x13f   : > { %1484 = vmatpush3.bf16.msra.mxu1 %v1481_v4 }
 0x140   : > { %1486 = vmatprep.subr.bf16.mxu1 %v1485_v8 }
 0x143   : > { %1488 = vmatpush3.bf16.msra.mxu1 %v1485_v8 }
 0x144   : > { %1490 = vmatprep.subr.bf16.mxu1 %v1489_v12 }
 0x147   : > { %1492 = vmatpush3.bf16.msra.mxu1 %v1489_v12 }
 0x14a   : > { %1331 = vmatmul.mubr.msk.f32.vlgmr.msra.gmra.mrb[0].mxu1 %vm273_vm0, %v1635_v27 }
 0x1e5   : > { %v1243_v11 = vpop.f32.mrb[2].mxu0 }
 0x1e6   : > { %v648_v13 = vpop.f32.mrb[3].mxu0  ;;  %v1493_v15 = vadd.f32 %v1243_v11, %v1052_v14 }
 0x1e7   : > { %v1495_v16 = vadd.f32 %v1052_v14, %v648_v13 }
 0x21d   : > { %v1332_v17 = vpop.f32.mrb[0].mxu1 }
 0x21e   : > { %v1494_v18 = vadd.f32 %v1493_v15, %v1332_v17  ;;  %v919_v19 = vpop.f32.mrb[1].mxu1 }
 0x21f   : > { %v1496_v20 = vadd.f32 %v1495_v16, %v919_v19 }
 0x220   : > { %v931_v21 = vmax.f32 %v1494_v18, 0.0 }
 0x221   : > { %v930_v22 = vmax.f32 %v1496_v20, 0.0 }
 0x222   : > { %933 = vst [vmem:[%s251_s19 + $0x8] sm:$0xff] %v931_v21 }
 0x223   : > { %932 = vst [vmem:[%s251_s19] sm:$0xff] %v930_v22 }
 0x224 PF: > { %s16_s21 = sadd.s32 1, %s1521_s21  }
 0x225   : > { %p13_p4 = scmp.ge.s32.totalorder %s16_s21, 4  }
 0x227   :  { %15 = sbr.rel (!%p13_p4) target bundleno = 1 (0x1), region = 78 }

</bundles_post_ra>
